<compile_context>
chip_gen: v6e
topology: v6e:2x2x1
jax: 0.10.0
libtpu: 0.0.40
codegen_flags: <defaults>
</compile_context>

<pallas_src>
import functools
from typing import NamedTuple

import jax
import jax.numpy as jnp
from jax.experimental import pallas as pl
from jax.experimental.pallas import tpu as pltpu

NEG_SLOPE = 0.01  # nn.LeakyReLU default negative_slope


def _round_up(a, b):
    return ((a + b - 1) // b) * b


def _physical_vmem_bytes():
    try:
        return int(pltpu.get_tpu_info().vmem_capacity_bytes)
    except Exception:
        return 64 << 20  # conservative: v7x per-TC VMEM


def _default_tm():
    # v6e needs ~715 flop/byte on weight traffic to be MXU-bound -> larger token tile.
    # v5e (~240 flop/byte) and v7x (~310) are compute-bound already around tm=512 (bf16).
    try:
        kind = jax.devices()[0].device_kind.lower()
    except Exception:
        return 512
    return 1024 if "v6" in kind else 512


def _pick_tk(h_pad128, target):
    """Largest multiple of 128 that divides the 128-padded hidden dim and is <= target,
    so H never rounds up by a near-full tile (no wasted MXU work on dead hidden units)."""
    if h_pad128 <= target:
        return h_pad128
    for mult in range(target // 128, 0, -1):
        tk = mult * 128
        if h_pad128 % tk == 0:
            return tk
    return 128


class MlpParams(NamedTuple):
    """Pre-padded / pre-cast parameters (built ONCE, outside the per-call path)."""
    w1: jax.Array          # (Cin, H_pad)     compute dtype
    b1: jax.Array          # (1, H_pad)       float32
    w2: jax.Array          # (H_pad, Cout_pad) compute dtype
    b2: jax.Array          # (1, Cout_pad)    float32
    out_features: int
    tk: int


def prepare_mlp_params(w1, b1, w2, b2, *, compute_dtype=jnp.bfloat16, tk_h=512):
    """Pad hidden/output dims to lane-dense multiples of 128 and cast the weight
    matrices to the MXU compute dtype once (hoisted out of the forward path)."""
    Cin, H = w1.shape
    Cout = w2.shape[1]
    H_pad = _round_up(H, 128)
    C_pad = _round_up(Cout, 128)
    tk = _pick_tk(H_pad, tk_h)

    w1p = jnp.pad(w1, ((0, 0), (0, H_pad - H))).astype(compute_dtype)
    b1p = jnp.pad(jnp.reshape(b1, (1, H)), ((0, 0), (0, H_pad - H))).astype(jnp.float32)
    w2p = jnp.pad(w2, ((0, H_pad - H), (0, C_pad - Cout))).astype(compute_dtype)
    b2p = jnp.pad(jnp.reshape(b2, (1, Cout)), ((0, 0), (0, C_pad - Cout))).astype(jnp.float32)
    return MlpParams(w1p, b1p, w2p, b2p, int(Cout), int(tk))


def _mlp_kernel_resident(x_ref, w1_ref, b1_ref, w2_ref, b2_ref, o_ref):
    # fc1 on the MXU (compute-dtype operands, f32 accumulation); bias + LeakyReLU in f32 on VPU.
    h = jnp.dot(x_ref[...], w1_ref[...], preferred_element_type=jnp.float32)
    h = h + b1_ref[...]
    h = jnp.maximum(h, NEG_SLOPE * h)        # LeakyReLU as a single VPU max
    # nn.Dropout(0.0) -> identity.
    out = jnp.dot(h.astype(w2_ref.dtype), w2_ref[...], preferred_element_type=jnp.float32)
    o_ref[...] = (out + b2_ref[...]).astype(o_ref.dtype)


def _mlp_kernel_tiled(x_ref, w1_ref, b1_ref, w2_ref, b2_ref, o_ref, acc_ref):
    k = pl.program_id(1)  # hidden-dim (reduction) axis

    @pl.when(k == 0)
    def _():
        # Seed the accumulator with fc2's bias so the last-k epilogue is a plain cast+store.
        acc_ref[...] = jnp.broadcast_to(b2_ref[...], acc_ref.shape)

    h = jnp.dot(x_ref[...], w1_ref[...], preferred_element_type=jnp.float32)
    h = h + b1_ref[...]
    h = jnp.maximum(h, NEG_SLOPE * h)
    # nn.Dropout(0.0) -> identity.
    acc_ref[...] += jnp.dot(h.astype(w2_ref.dtype), w2_ref[...],
                            preferred_element_type=jnp.float32)

    @pl.when(k == pl.num_programs(1) - 1)
    def _():
        o_ref[...] = acc_ref[...].astype(o_ref.dtype)


@functools.partial(jax.jit,
                   static_argnames=("out_features", "tk", "tm", "force_tiled"))
def _mlp_forward_padded(x, w1p, b1p, w2p, b2p, *, out_features, tk, tm,
                        force_tiled=False):
    *lead, Cin = x.shape
    M = 1
    for d in lead:
        M *= d
    H_pad = w1p.shape[1]
    C_pad = w2p.shape[1]
    compute_dtype = w1p.dtype
    out_dtype = x.dtype
    c_item = jnp.dtype(compute_dtype).itemsize
    o_item = jnp.dtype(out_dtype).itemsize

    # --- balanced token tiles: avoid padding a near-full tile when M % tm is small.
    n_i = max(1, -(-M // tm))                          # number of token tiles
    sub = 8 if c_item >= 4 else 16                     # sublane granularity of x blocks
    tm_eff = _round_up(-(-M // n_i), sub)
    M_pad = tm_eff * n_i

    x2d = x.reshape(M, Cin)
    if M_pad != M:
        x2d = jnp.pad(x2d, ((0, M_pad - M), (0, 0)))
    x2d = x2d.astype(compute_dtype)                    # halve activation DMA bytes

    num_k = H_pad // tk
    weight_bytes = (Cin * H_pad + H_pad * C_pad) * c_item + (H_pad + C_pad) * 4
    phys_vmem = _physical_vmem_bytes()

    token_io_bytes = 2 * (tm_eff * Cin * c_item + tm_eff * C_pad * o_item)
    resident = (not force_tiled) and (
        num_k == 1
        or (2 * weight_bytes + token_io_bytes
            + tm_eff * (H_pad + C_pad) * 4) <= phys_vmem // 2)

    flops = 2 * M_pad * (Cin * H_pad + H_pad * C_pad)
    bytes_accessed = (M_pad * Cin * c_item + weight_bytes + M_pad * C_pad * o_item)
    cost = pl.CostEstimate(flops=flops, transcendentals=0,
                           bytes_accessed=bytes_accessed)

    if resident:
        # Weights VMEM-resident across all token tiles (constant block index -> DMA'd once).
        need = (token_io_bytes + 2 * weight_bytes + tm_eff * (H_pad + C_pad) * 4)
        vmem_limit = min(max(int(need * 1.3), 32 << 20), int(phys_vmem * 0.9))
        out2d = pl.pallas_call(
            _mlp_kernel_resident,
            out_shape=jax.ShapeDtypeStruct((M_pad, C_pad), out_dtype),
            grid=(n_i,),
            in_specs=[
                pl.BlockSpec((tm_eff, Cin), lambda i: (i, 0)),   # x token tile
                pl.BlockSpec((Cin, H_pad), lambda i: (0, 0)),    # full fc1 weight (resident)
                pl.BlockSpec((1, H_pad), lambda i: (0, 0)),      # fc1 bias (f32)
                pl.BlockSpec((H_pad, C_pad), lambda i: (0, 0)),  # full fc2 weight (resident)
                pl.BlockSpec((1, C_pad), lambda i: (0, 0)),      # fc2 bias (f32)
            ],
            out_specs=pl.BlockSpec((tm_eff, C_pad), lambda i: (i, 0)),
            compiler_params=pltpu.CompilerParams(
                dimension_semantics=("parallel",),
                vmem_limit_bytes=vmem_limit),
            cost_estimate=cost,
        )(x2d, w1p, b1p, w2p, b2p)
    else:
        # Hidden dim streamed on a trailing reduction axis; fc2 partials accumulate
        # into an f32 VMEM scratch seeded with b2.
        need = (2 * (tm_eff * Cin * c_item
                     + Cin * tk * c_item
                     + tk * 4
                     + tk * C_pad * c_item
                     + C_pad * 4
                     + tm_eff * C_pad * o_item)
                + tm_eff * C_pad * 4        # acc scratch
                + tm_eff * tk * 4)          # fc1 activation temp
        vmem_limit = min(max(int(need * 1.3), 32 << 20), int(phys_vmem * 0.9))
        # TODO(synk): add an optional Cout grid axis for very wide models so w2/acc/out
        # tiles stay bounded on v7x's 64 MiB VMEM.
        out2d = pl.pallas_call(
            _mlp_kernel_tiled,
            out_shape=jax.ShapeDtypeStruct((M_pad, C_pad), out_dtype),
            grid=(n_i, num_k),
            in_specs=[
                pl.BlockSpec((tm_eff, Cin), lambda i, k: (i, 0)),  # x tile (resident over k)
                pl.BlockSpec((Cin, tk), lambda i, k: (0, k)),      # fc1 weight slice
                pl.BlockSpec((1, tk), lambda i, k: (0, k)),        # fc1 bias slice (f32)
                pl.BlockSpec((tk, C_pad), lambda i, k: (k, 0)),    # fc2 weight slice
                pl.BlockSpec((1, C_pad), lambda i, k: (0, 0)),     # fc2 bias (f32)
            ],
            out_specs=pl.BlockSpec((tm_eff, C_pad), lambda i, k: (i, 0)),
            scratch_shapes=[pltpu.VMEM((tm_eff, C_pad), jnp.float32)],
            compiler_params=pltpu.CompilerParams(
                dimension_semantics=("parallel", "arbitrary"),
                vmem_limit_bytes=vmem_limit),
            cost_estimate=cost,
        )(x2d, w1p, b1p, w2p, b2p)

    return out2d[:M, :out_features].reshape(*lead, out_features)


def mlp_forward(x, params: MlpParams, *, tm=None, force_tiled=False):
    """x: (..., Cin) -> (..., out_features)."""
    if tm is None:
        tm = _default_tm()
    return _mlp_forward_padded(
        x, params.w1, params.b1, params.w2, params.b2,
        out_features=params.out_features, tk=params.tk, tm=tm,
        force_tiled=force_tiled)


def init_mlp_params(key, in_features, hidden_features, out_features, dtype=jnp.float32):
    """Mimics nn.Linear's uniform(-1/sqrt(fan_in), 1/sqrt(fan_in)) init.
    Weights stored pre-transposed: (in, hidden), (hidden, out)."""
    k1, k2, k3, k4 = jax.random.split(key, 4)
    bound1 = 1.0 / (in_features ** 0.5)
    bound2 = 1.0 / (hidden_features ** 0.5)
    w1 = jax.random.uniform(k1, (in_features, hidden_features), dtype, -bound1, bound1)
    b1 = jax.random.uniform(k2, (hidden_features,), dtype, -bound1, bound1)
    w2 = jax.random.uniform(k3, (hidden_features, out_features), dtype, -bound2, bound2)
    b2 = jax.random.uniform(k4, (out_features,), dtype, -bound2, bound2)
    return w1, b1, w2, b2


def mlp_reference(x, w1, b1, w2, b2):
    h = x @ w1 + b1
    h = jnp.maximum(h, NEG_SLOPE * h)
    return h @ w2 + b2


if __name__ == "__main__":
    B, S = 2, 8
    in_features, hidden_features, out_features = 32, 64, 32

    key = jax.random.PRNGKey(0)
    kx, kp = jax.random.split(key)
    x = jax.random.normal(kx, (B, S, in_features), jnp.float32)
    w1, b1, w2, b2 = init_mlp_params(kp, in_features, hidden_features, out_features)

    ref = mlp_reference(x, w1, b1, w2, b2)

    # 1) f32 compute path (resident-weights fast path) -- tighter check.
    params_f32 = prepare_mlp_params(w1, b1, w2, b2, compute_dtype=jnp.float32)
    out_f32 = mlp_forward(x, params_f32)
    jax.block_until_ready(out_f32)
    assert out_f32.shape == (B, S, out_features)
    assert jnp.allclose(out_f32, ref, atol=1e-2, rtol=1e-2)

    # 2) Default bf16 compute path (resident-weights fast path) -- loose check.
    params_bf16 = prepare_mlp_params(w1, b1, w2, b2)
    out_bf16 = mlp_forward(x, params_bf16)
    jax.block_until_ready(out_bf16)
    assert out_bf16.shape == (B, S, out_features)
    assert jnp.allclose(out_bf16, ref, atol=5e-2, rtol=5e-2)

    # 3) Streaming / hidden-tiled path (forced), with a larger hidden dim so num_k > 1.
    hidden_big = 256
    w1b, b1b, w2b, b2b = init_mlp_params(kp, in_features, hidden_big, out_features)
    ref_big = mlp_reference(x, w1b, b1b, w2b, b2b)
    params_big = prepare_mlp_params(w1b, b1b, w2b, b2b, tk_h=128)
    out_big = mlp_forward(x, params_big, force_tiled=True)
    jax.block_until_ready(out_big)
    assert out_big.shape == (B, S, out_features)
    assert jnp.allclose(out_big, ref_big, atol=5e-2, rtol=5e-2)

    print("KERNEL_OK")
</pallas_src>

<mosaic_0001>
module attributes {stable_mosaic.version = 11 : i64} {
  func.func @_mlp_kernel_resident(%arg0: i32, %arg1: memref<16x32xf32, #tpu.memory_space<vmem>>, %arg2: memref<32x128xf32, #tpu.memory_space<vmem>>, %arg3: memref<1x128xf32, #tpu.memory_space<vmem>>, %arg4: memref<128x128xf32, #tpu.memory_space<vmem>>, %arg5: memref<1x128xf32, #tpu.memory_space<vmem>>, %arg6: memref<16x128xf32, #tpu.memory_space<vmem>>) attributes {dimension_semantics = [#tpu.dimension_semantics<parallel>], iteration_bounds = array<i64: 1>, scalar_prefetch = 0 : i64, scratch_operands = 0 : i64, tpu.core_type = #tpu.core_type<tc>, window_params = [{transform_indices = @transform_0, window_bounds = array<i64: 16, 32>}, {pipeline_mode = #tpu.pipeline_mode<synchronous>, transform_indices = @transform_1, window_bounds = array<i64: 32, 128>}, {pipeline_mode = #tpu.pipeline_mode<synchronous>, transform_indices = @transform_2, window_bounds = array<i64: 1, 128>}, {pipeline_mode = #tpu.pipeline_mode<synchronous>, transform_indices = @transform_3, window_bounds = array<i64: 128, 128>}, {pipeline_mode = #tpu.pipeline_mode<synchronous>, transform_indices = @transform_4, window_bounds = array<i64: 1, 128>}, {transform_indices = @transform_5, window_bounds = array<i64: 16, 128>}]} {
    %c0 = arith.constant 0 : index
    %c0_0 = arith.constant 0 : index
    %0 = vector.load %arg1[%c0, %c0_0] : memref<16x32xf32, #tpu.memory_space<vmem>>, vector<16x32xf32>
    %c0_1 = arith.constant 0 : index
    %c0_2 = arith.constant 0 : index
    %1 = vector.load %arg2[%c0_1, %c0_2] : memref<32x128xf32, #tpu.memory_space<vmem>>, vector<32x128xf32>
    %cst = arith.constant dense<0.000000e+00> : vector<16x128xf32>
    %2 = tpu.matmul %0, %1, %cst {dimension_numbers = #tpu.dot_dimension_numbers<[1], [0], [0], [1], [0, 0, 1, 1], [], []>} : vector<16x32xf32>, vector<32x128xf32>, vector<16x128xf32> -> vector<16x128xf32>
    %c0_3 = arith.constant 0 : index
    %c0_4 = arith.constant 0 : index
    %3 = vector.load %arg3[%c0_3, %c0_4] : memref<1x128xf32, #tpu.memory_space<vmem>>, vector<1x128xf32>
    %4 = vector.broadcast %3 : vector<1x128xf32> to vector<16x128xf32>
    %5 = arith.addf %2, %4 : vector<16x128xf32>
    %cst_5 = arith.constant 0.00999999977 : f32
    %6 = vector.broadcast %cst_5 : f32 to vector<16x128xf32>
    %7 = arith.mulf %6, %5 : vector<16x128xf32>
    %8 = arith.maximumf %5, %7 : vector<16x128xf32>
    %c0_6 = arith.constant 0 : index
    %c0_7 = arith.constant 0 : index
    %9 = vector.load %arg4[%c0_6, %c0_7] : memref<128x128xf32, #tpu.memory_space<vmem>>, vector<128x128xf32>
    %cst_8 = arith.constant dense<0.000000e+00> : vector<16x128xf32>
    %10 = tpu.matmul %8, %9, %cst_8 {dimension_numbers = #tpu.dot_dimension_numbers<[1], [0], [0], [1], [0, 0, 1, 1], [], []>} : vector<16x128xf32>, vector<128x128xf32>, vector<16x128xf32> -> vector<16x128xf32>
    %c0_9 = arith.constant 0 : index
    %c0_10 = arith.constant 0 : index
    %11 = vector.load %arg5[%c0_9, %c0_10] : memref<1x128xf32, #tpu.memory_space<vmem>>, vector<1x128xf32>
    %12 = vector.broadcast %11 : vector<1x128xf32> to vector<16x128xf32>
    %13 = arith.addf %10, %12 : vector<16x128xf32>
    %c0_11 = arith.constant 0 : index
    %c0_12 = arith.constant 0 : index
    %14 = vector.load %arg6[%c0_11, %c0_12] : memref<16x128xf32, #tpu.memory_space<vmem>>, vector<16x128xf32>
    tpu.vector_store %arg6[%c0_11, %c0_12], %13 {strides = array<i32>} : memref<16x128xf32, #tpu.memory_space<vmem>>, vector<16x128xf32>,
    return
  }
  func.func @transform_0(%arg0: i32) -> (i32, i32) {
    %c0_i32 = arith.constant 0 : i32
    %c0_i32_0 = arith.constant 0 : i32
    return %arg0, %c0_i32 : i32, i32
  }
  func.func @transform_1(%arg0: i32) -> (i32, i32) {
    %c0_i32 = arith.constant 0 : i32
    %c0_i32_0 = arith.constant 0 : i32
    %c0_i32_1 = arith.constant 0 : i32
    return %c0_i32, %c0_i32_0 : i32, i32
  }
  func.func @transform_2(%arg0: i32) -> (i32, i32) {
    %c0_i32 = arith.constant 0 : i32
    %c0_i32_0 = arith.constant 0 : i32
    %c0_i32_1 = arith.constant 0 : i32
    return %c0_i32, %c0_i32_0 : i32, i32
  }
  func.func @transform_3(%arg0: i32) -> (i32, i32) {
    %c0_i32 = arith.constant 0 : i32
    %c0_i32_0 = arith.constant 0 : i32
    %c0_i32_1 = arith.constant 0 : i32
    return %c0_i32, %c0_i32_0 : i32, i32
  }
  func.func @transform_4(%arg0: i32) -> (i32, i32) {
    %c0_i32 = arith.constant 0 : i32
    %c0_i32_0 = arith.constant 0 : i32
    %c0_i32_1 = arith.constant 0 : i32
    return %c0_i32, %c0_i32_0 : i32, i32
  }
  func.func @transform_5(%arg0: i32) -> (i32, i32) {
    %c0_i32 = arith.constant 0 : i32
    %c0_i32_0 = arith.constant 0 : i32
    return %arg0, %c0_i32 : i32, i32
  }
}

</mosaic_0001>

<bundles_post_ra>
// kernel: _mlp_forward_padded.1
= control target key start
LH: loop header
LB: loop body
LE: loop exit
PB: predicated region body
PF: predicated region fallthrough
CT: control target
= control target key end

     0   :  { %10 = vsyncpa [#allocation3], 0  ;;  %s467_s0 = inlined_call_operand.hbm [shape: f32[16,32], index: 0, kind: input, shape index: {}]   ;;  %s468_s1 = inlined_call_operand.hbm [shape: f32[32,128], index: 1, kind: input, shape index: {}]   ;;  %s469_s2 = inlined_call_operand.vmem [shape: f32[1,128], index: 2, kind: input, shape index: {}]   ;;  %s470_s3 = inlined_call_operand.hbm [shape: f32[128,128], index: 3, kind: input, shape index: {}]   ;;  %s471_s4 = inlined_call_operand.vmem [shape: f32[1,128], index: 4, kind: input, shape index: {}]   ;;  %s472_s5 = inlined_call_operand.vmem [shape: f32[16,128], index: 5, kind: output, shape index: {}]  }
   0x1   :  { %11 = vsyncpa [#allocation5], 0  ;;  %s409_s18 = smov [#allocation4]   ;;  %s410_s20 = smov [#allocation2]  }
   0x2   :  { %s29_s19 = sshll.u32 %s409_s18, 4  ;;  %s17_s21 = sshll.u32 %s410_s20, 4  ;;  %s30_s19 = int_to_ptr.vmem [resolvable:$true] %s29_s19  ;;  %s18_s21 = int_to_ptr.vmem [resolvable:$true] %s17_s21 }
   0x3   :  { %s353_s22 = scalar_lea.vmem %s30_s19, 512  ;;  %p358_p1 = scmp.lt.s32.totalorder %s30_s19, %s30_s19 }
   0x4   :  { %p354_p0 = scmp.ne.s32.totalorder %s30_s19, %s353_s22  ;;  %p359_p2 = scmp.lt.s32.totalorder %s353_s22, %s353_s22 }
   0x6   :  { %p360_p3 = por %p359_p2, %p358_p1 }
   0x8   :  { %p361_p4 = pnand %p360_p3, %p354_p0 }
   0xa   :  { %364 = shalt.err (!%p361_p4)
}
   0xb   :  { %s411_s23 = smov 128   ;;  %s412_s24 = smov 8  }
   0xc   :  { %35 = dma.hbm_to_vmem [thread:$0]  %s468_s1, 512, %s30_s19, [#allocation5], %s411_s23, %s411_s23, %s412_s24  }
   0xd   :  { %s373_s27 = scalar_lea.vmem %s18_s21, 256  ;;  %p378_p6 = scmp.lt.s32.totalorder %s18_s21, %s18_s21 }
   0xe   :  { %p374_p5 = scmp.ne.s32.totalorder %s18_s21, %s373_s27  ;;  %p379_p7 = scmp.lt.s32.totalorder %s373_s27, %s373_s27 }
  0x10   :  { %p380_p8 = por %p379_p7, %p378_p6 }
  0x12   :  { %p381_p9 = pnand %p380_p8, %p374_p5 }
  0x14   :  { %384 = shalt.err (!%p381_p9)
}
  0x15   :  { %23 = dma.hbm_to_vmem [thread:$0]  %s467_s0, 256, %s18_s21, [#allocation3], %s411_s23, %s411_s23, %s412_s24  }
  0x16   :  { %s413_s30 = smov [#allocation6]  }
  0x17   :  { %s43_s6 = sshll.u32 %s413_s30, 4  ;;  %s44_s6 = int_to_ptr.vmem [resolvable:$true] %s43_s6 }
  0x18   :  { %s393_s7 = scalar_lea.vmem %s44_s6, 2048  ;;  %p398_p11 = scmp.lt.s32.totalorder %s44_s6, %s44_s6 }
  0x19   :  { %p394_p10 = scmp.ne.s32.totalorder %s44_s6, %s393_s7  ;;  %p399_p12 = scmp.lt.s32.totalorder %s393_s7, %s393_s7 }
  0x1b   :  { %p400_p13 = por %p399_p12, %p398_p11 }
  0x1d   :  { %p401_p0 = pnand %p400_p13, %p394_p10 }
  0x1f   :  { %404 = shalt.err (!%p401_p0)
}
  0x20   :  { %49 = dma.hbm_to_vmem [thread:$0]  %s470_s3, 2048, %s44_s6, [#allocation5], %s411_s23, %s411_s23, %s412_s24  }
  0x21   :  { %405 = dma.done.wait [#allocation3], 256  }
  0x22   :  { %406 = vsyncadd [#allocation3], 4294967040 }
  0x23   :  { %407 = dma.done.wait [#allocation5], 2560  }
  0x24   :  { %408 = vsyncadd [#allocation5], 4294964736  ;;  %vm74_vm0 = vcmask 261120   ;;  %v66_v0 = vld [vmem:[#allocation4 + $0x18] sm:$0xff]  ;;  %v65_v1 = vld [vmem:[#allocation4 + $0x10] sm:$0xff] }
  0x25   :  { %294 = vmatprep.subr.mxu0 %v66_v0  ;;  %v61_v2 = vld [vmem:[#allocation2] sm:$0xff]  ;;  %v64_v3 = vld [vmem:[#allocation4 + $0x8] sm:$0xff]  ;;  %v175_v4 = vld [vmem:[#allocation6 + $0x78] sm:$0xff] }
  0x26   :  { %295 = vmatpush3.msra.mxu0 %v66_v0  ;;  %302 = vmatprep.mubr.msk.f32.mxu0 %vm74_vm0, %v61_v2  ;;  %v174_v5 = vld [vmem:[#allocation6 + $0x70] sm:$0xff]  ;;  %v63_v6 = vld [vmem:[#allocation4] sm:$0xff]  ;;  %v173_v7 = vld [vmem:[#allocation6 + $0x68] sm:$0xff] }
  0x27   :  { %296 = vmatprep.subr.mxu0 %v65_v1  ;;  %305 = vmatprep.subr.mxu1 %v175_v4  ;;  %v62_v8 = vld [vmem:[#allocation2 + $0x8] sm:$0xff]  ;;  %v172_v9 = vld [vmem:[#allocation6 + $0x60] sm:$0xff]  ;;  %v170_v11 = vld [vmem:[#allocation6 + $0x50] sm:$0xff] }
  0x28   :  { %297 = vmatpush3.msra.mxu0 %v65_v1  ;;  %306 = vmatpush3.msra.mxu1 %v175_v4  ;;  %v171_v10 = vld [vmem:[#allocation6 + $0x58] sm:$0xff]  ;;  %v169_v12 = vld [vmem:[#allocation6 + $0x48] sm:$0xff]  ;;  %v168_v13 = vld [vmem:[#allocation6 + $0x40] sm:$0xff] }
  0x29   :  { %298 = vmatprep.subr.mxu0 %v64_v3  ;;  %307 = vmatprep.subr.mxu1 %v174_v5  ;;  %v167_v14 = vld [vmem:[#allocation6 + $0x38] sm:$0xff]  ;;  %v166_v15 = vld [vmem:[#allocation6 + $0x30] sm:$0xff]  ;;  %v165_v16 = vld [vmem:[#allocation6 + $0x28] sm:$0xff] }
  0x2a   :  { %299 = vmatpush3.msra.mxu0 %v64_v3  ;;  %308 = vmatpush3.msra.mxu1 %v174_v5  ;;  %v164_v17 = vld [vmem:[#allocation6 + $0x20] sm:$0xff]  ;;  %v163_v18 = vld [vmem:[#allocation6 + $0x18] sm:$0xff]  ;;  %v162_v19 = vld [vmem:[#allocation6 + $0x10] sm:$0xff] }
  0x2b   :  { %300 = vmatprep.subr.mxu0 %v63_v6  ;;  %309 = vmatprep.subr.mxu1 %v173_v7  ;;  %v161_v20 = vld [vmem:[#allocation6 + $0x8] sm:$0xff]  ;;  %v160_v21 = vld [vmem:[#allocation6] sm:$0xff]  ;;  %v266_v22 = vld [vmem:[%s469_s2] ss:$0 sm:$0xff] }
  0x2c   :  { %301 = vmatpush3.msra.mxu0 %v63_v6  ;;  %310 = vmatpush3.msra.mxu1 %v173_v7  ;;  %v269_v31 = vld [vmem:[%s471_s4] ss:$0 sm:$0xff] }
  0x2d   :  { %303 = vmatmul.mubr.msk.f32.vlgmr.msra.gmra.mxu0 %vm74_vm0, %v62_v8  ;;  %311 = vmatprep.subr.mxu1 %v172_v9 }
  0x2e   :  { %312 = vmatpush3.msra.mxu1 %v172_v9 }
  0x2f   :  { %313 = vmatprep.subr.mxu1 %v171_v10 }
  0x30   :  { %314 = vmatpush3.msra.mxu1 %v171_v10 }
  0x31   :  { %315 = vmatprep.subr.mxu1 %v170_v11 }
  0x32   :  { %316 = vmatpush3.msra.mxu1 %v170_v11 }
  0x33   :  { %317 = vmatprep.subr.mxu1 %v169_v12 }
  0x34   :  { %318 = vmatpush3.msra.mxu1 %v169_v12 }
  0x35   :  { %319 = vmatprep.subr.mxu1 %v168_v13 }
  0x36   :  { %320 = vmatpush3.msra.mxu1 %v168_v13 }
  0x37   :  { %321 = vmatprep.subr.mxu1 %v167_v14 }
  0x38   :  { %322 = vmatpush3.msra.mxu1 %v167_v14 }
  0x39   :  { %323 = vmatprep.subr.mxu1 %v166_v15 }
  0x3a   :  { %324 = vmatpush3.msra.mxu1 %v166_v15 }
  0x3b   :  { %325 = vmatprep.subr.mxu1 %v165_v16 }
  0x3c   :  { %326 = vmatpush3.msra.mxu1 %v165_v16 }
  0x3d   :  { %327 = vmatprep.subr.mxu1 %v164_v17 }
  0x3e   :  { %328 = vmatpush3.msra.mxu1 %v164_v17 }
  0x3f   :  { %329 = vmatprep.subr.mxu1 %v163_v18 }
  0x40   :  { %330 = vmatpush3.msra.mxu1 %v163_v18 }
  0x41   :  { %331 = vmatprep.subr.mxu1 %v162_v19 }
  0x42   :  { %332 = vmatpush3.msra.mxu1 %v162_v19 }
  0x43   :  { %333 = vmatprep.subr.mxu1 %v161_v20 }
  0x44   :  { %334 = vmatpush3.msra.mxu1 %v161_v20 }
  0x45   :  { %335 = vmatprep.subr.mxu1 %v160_v21 }
  0x46   :  { %336 = vmatpush3.msra.mxu1 %v160_v21 }
  0xed   :  { %v304_v23 = vpop.f32.mrf.mxu0 }
  0xee   :  { %v153_v24 = vadd.f32 %v304_v23, %v266_v22 }
  0xef   :  { %v147_v25 = vpop.f32.mrf.mxu0 }
  0xf0   :  { %v148_v26 = vadd.f32 %v266_v22, %v147_v25  ;;  %v157_v27 = vmul.f32 0.01, %v153_v24 }
  0xf2   :  { %v156_v28 = vmul.f32 0.01, %v148_v26  ;;  %v159_v30 = vmax.f32 %v153_v24, %v157_v27 }
  0xf4   :  { %v158_v29 = vmax.f32 %v148_v26, %v156_v28 }
  0xf6   :  { %337 = vmatprep.mubr.f32.mxu1 %v158_v29 }
  0xf7   :  { %338 = vmatmul.mubr.f32.vlgmr.msra.gmra.mxu1 %v159_v30 }
 0x1b7   :  { %v339_v32 = vpop.f32.mrf.mxu1 }
 0x1b8   :  { %v255_v33 = vadd.f32 %v339_v32, %v269_v31 }
 0x1b9   :  { %v249_v34 = vpop.f32.mrf.mxu1 }
 0x1ba   :  { %259 = vst [vmem:[%s472_s5 + $0x8] sm:$0xff] %v255_v33  ;;  %v250_v35 = vadd.f32 %v269_v31, %v249_v34 }
 0x1bc   :  { %258 = vst [vmem:[%s472_s5] sm:$0xff] %v250_v35 }
 0x1bd   :  { %264 = vsyncpa [#allocation3], 1 }
 0x1be   :  { %265 = vsyncpa [#allocation5], 1 }

</bundles_post_ra>
